<compile_context>
chip_gen: v7x
topology: tpu7x:2x2x1
jax: 0.10.0
libtpu: 0.0.40
codegen_flags: <defaults>
</compile_context>

<pallas_src>
import functools

import jax
import jax.numpy as jnp
from jax.experimental import pallas as pl
from jax.experimental.pallas import tpu as pltpu

LN_EPS = 1e-5  # torch.nn.LayerNorm default


# ---------------------------------------------------------------------------
# Stage 1: W_all[b, :] = (sum_m Z[b, m, :]) @ alpha_flat     (one MXU matmul)
# ---------------------------------------------------------------------------
def _w_prep_kernel(z_ref, alpha_ref, w_ref):
    # z_ref:     (B, M, d)
    # alpha_ref: (d, p * h_pad)  -- alpha pre-transposed so the contraction
    #                               dim d is NOT the lane axis (MXU, not VPU+XLU)
    # w_ref:     (B, p * h_pad)
    z_sum = jnp.sum(z_ref[...], axis=1)  # (B, d) invariant row reduction of Z
    w_ref[...] = jnp.dot(
        z_sum, alpha_ref[...], preferred_element_type=jnp.float32
    ).astype(w_ref.dtype)


# ---------------------------------------------------------------------------
# Stage 2: row-tiled matmul + fused bias / LayerNorm / ReLU epilogue
# ---------------------------------------------------------------------------
def _ebl_kernel(x_ref, w_ref, bias_ref, gamma_ref, beta_ref, o_ref, *, inv_h):
    # x_ref:     (TM, p)      row tile of X for the current batch
    # w_ref:     (p, h_pad)   per-batch bilinear weight (padded cols are zero)
    # bias_ref:  (1, h_pad)   (padded cols zero)
    # gamma_ref: (1, h_pad)   LayerNorm scale (padded cols zero)
    # beta_ref:  (1, h_pad)   LayerNorm shift (padded cols zero)
    # o_ref:     (TM, h_pad)  lane-dense output tile
    acc = jnp.dot(x_ref[...], w_ref[...], preferred_element_type=jnp.float32)
    acc = acc + bias_ref[...]  # padded columns remain exactly 0

    # Single-pass LayerNorm statistics over the real h columns.  Padded lanes
    # of `acc` are exactly zero, so full-lane sums equal real-h sums.
    s = jnp.sum(acc, axis=-1, keepdims=True)
    sq = jnp.sum(acc * acc, axis=-1, keepdims=True)
    mean = s * inv_h
    var = sq * inv_h - mean * mean
    inv_std = jax.lax.rsqrt(var + LN_EPS)

    normed = (acc - mean) * inv_std * gamma_ref[...] + beta_ref[...]
    o_ref[...] = jnp.maximum(normed, 0.0).astype(o_ref.dtype)


def _choose_row_tile(n):
    for tm in (512, 256, 128, 64, 32, 16, 8):
        if n % tm == 0:
            return tm
    return n  # fall back to the full (ragged) row dim


def equivariant_bilinear_forward(X, Z, alpha, bias, gamma, beta_ln):
    B, N, p = X.shape
    _, M, d = Z.shape
    _, h, _ = alpha.shape

    h_pad = pl.cdiv(h, 128) * 128
    pad = h_pad - h

    # Layout plumbing only: alpha -> (d, p*h_pad), params -> lane-dense (1, h_pad).
    alpha_t = jnp.pad(jnp.transpose(alpha, (2, 0, 1)), ((0, 0), (0, 0), (0, pad)))
    alpha_flat = alpha_t.reshape(d, p * h_pad).astype(jnp.float32)
    bias_p = jnp.pad(bias, (0, pad)).reshape(1, h_pad).astype(jnp.float32)
    gamma_p = jnp.pad(gamma, (0, pad)).reshape(1, h_pad).astype(jnp.float32)
    beta_p = jnp.pad(beta_ln, (0, pad)).reshape(1, h_pad).astype(jnp.float32)

    # ---- Stage 1: per-batch weight W[b] = Z_sum[b] . alpha ----
    w_flat = pl.pallas_call(
        _w_prep_kernel,
        out_shape=jax.ShapeDtypeStruct((B, p * h_pad), jnp.float32),
        grid_spec=pltpu.PrefetchScalarGridSpec(
            num_scalar_prefetch=0,
            grid=(1,),
            in_specs=[
                pl.BlockSpec((B, M, d), lambda i: (0, 0, 0)),
                pl.BlockSpec((d, p * h_pad), lambda i: (0, 0)),
            ],
            out_specs=pl.BlockSpec((B, p * h_pad), lambda i: (0, 0)),
        ),
        compiler_params=pltpu.CompilerParams(
            dimension_semantics=("arbitrary",),
        ),
    )(Z.astype(jnp.float32), alpha_flat)
    w_all = w_flat.reshape(B, p, h_pad)

    # ---- Stage 2: row-tiled matmul + LN/ReLU epilogue ----
    TM = _choose_row_tile(N)
    R = N // TM

    # VMEM budget: double-buffered X / out tiles + resident W + params (f32).
    vmem_needed = 2 * 4 * (TM * p + p * h_pad + TM * h_pad + 3 * h_pad)
    vmem_limit = int(min(48 * 1024 * 1024, max(32 * 1024 * 1024, 4 * vmem_needed)))

    kernel = functools.partial(_ebl_kernel, inv_h=1.0 / float(h))
    out_pad = pl.pallas_call(
        kernel,
        out_shape=jax.ShapeDtypeStruct((B, N, h_pad), X.dtype),
        grid_spec=pltpu.PrefetchScalarGridSpec(
            num_scalar_prefetch=0,
            grid=(B, R),
            in_specs=[
                pl.BlockSpec((None, TM, p), lambda b, r: (b, r, 0)),     # X rows
                pl.BlockSpec((None, p, h_pad), lambda b, r: (b, 0, 0)),  # W[b]
                pl.BlockSpec((1, h_pad), lambda b, r: (0, 0)),           # bias
                pl.BlockSpec((1, h_pad), lambda b, r: (0, 0)),           # LN gamma
                pl.BlockSpec((1, h_pad), lambda b, r: (0, 0)),           # LN beta
            ],
            out_specs=pl.BlockSpec((None, TM, h_pad), lambda b, r: (b, r, 0)),
        ),
        compiler_params=pltpu.CompilerParams(
            dimension_semantics=("parallel", "parallel"),
            vmem_limit_bytes=vmem_limit,
        ),
    )(X, w_all, bias_p, gamma_p, beta_p)

    return out_pad[..., :h]


def reference_forward(X, Z, alpha, bias, gamma, beta_ln):
    z_sum = jnp.sum(Z, axis=1)                                    # (B, d)
    x_alpha = jnp.einsum('bnp,phd,bd->bnh', X, alpha, z_sum)      # (B, N, h)
    x_star = x_alpha + bias[None, None, :]
    mean = jnp.mean(x_star, axis=-1, keepdims=True)
    var = jnp.mean((x_star - mean) ** 2, axis=-1, keepdims=True)
    normed = (x_star - mean) / jnp.sqrt(var + LN_EPS)
    normed = normed * gamma[None, None, :] + beta_ln[None, None, :]
    return jnp.maximum(normed, 0.0)


if __name__ == "__main__":
    # Small, module-consistent shapes: batch=2, N=8 particles, p=32, d=16, h=32.
    B, N, M, p, d, h = 2, 8, 8, 32, 16, 32

    key = jax.random.PRNGKey(0)
    k_x, k_z, k_alpha, k_bias = jax.random.split(key, 4)

    X = jax.random.normal(k_x, (B, N, p), dtype=jnp.float32)
    Z = jax.random.normal(k_z, (B, M, d), dtype=jnp.float32)

    # Deterministic parameter init (matches shapes of nn.Parameter(torch.randn(...)))
    alpha = jax.random.normal(k_alpha, (p, h, d), dtype=jnp.float32)
    bias = jax.random.normal(k_bias, (h,), dtype=jnp.float32)
    gamma = jnp.ones((h,), dtype=jnp.float32)      # nn.LayerNorm default weight
    beta_ln = jnp.zeros((h,), dtype=jnp.float32)   # nn.LayerNorm default bias

    out = equivariant_bilinear_forward(X, Z, alpha, bias, gamma, beta_ln)
    out = jax.block_until_ready(out)

    ref = reference_forward(X, Z, alpha, bias, gamma, beta_ln)
    assert out.shape == (B, N, h)
    assert jnp.allclose(out, ref, atol=1e-4, rtol=1e-4), (
        f"max abs diff = {jnp.max(jnp.abs(out - ref))}"
    )

    print("KERNEL_OK")
</pallas_src>

<mosaic_0001>
module attributes {stable_mosaic.version = 11 : i64} {
  func.func @_w_prep_kernel(%arg0: i32, %arg1: memref<2x8x16xf32, #tpu.memory_space<vmem>>, %arg2: memref<16x4096xf32, #tpu.memory_space<vmem>>, %arg3: memref<2x4096xf32, #tpu.memory_space<vmem>>) attributes {dimension_semantics = [#tpu.dimension_semantics<arbitrary>], iteration_bounds = array<i64: 1>, scalar_prefetch = 0 : i64, scratch_operands = 0 : i64, tpu.core_type = #tpu.core_type<tc>, window_params = [{pipeline_mode = #tpu.pipeline_mode<synchronous>, transform_indices = @transform_0, window_bounds = array<i64: 2, 8, 16>}, {pipeline_mode = #tpu.pipeline_mode<synchronous>, transform_indices = @transform_1, window_bounds = array<i64: 16, 4096>}, {pipeline_mode = #tpu.pipeline_mode<synchronous>, transform_indices = @transform_2, window_bounds = array<i64: 2, 4096>}]} {
    %c0 = arith.constant 0 : index
    %c0_0 = arith.constant 0 : index
    %c0_1 = arith.constant 0 : index
    %0 = vector.load %arg1[%c0, %c0_0, %c0_1] : memref<2x8x16xf32, #tpu.memory_space<vmem>>, vector<2x8x16xf32>
    %cst = arith.constant dense<0.000000e+00> : vector<2x16xf32>
    %1 = vector.multi_reduction <add>, %0, %cst [1] : vector<2x8x16xf32> to vector<2x16xf32>
    %c0_2 = arith.constant 0 : index
    %c0_3 = arith.constant 0 : index
    %2 = vector.load %arg2[%c0_2, %c0_3] : memref<16x4096xf32, #tpu.memory_space<vmem>>, vector<16x4096xf32>
    %cst_4 = arith.constant dense<0.000000e+00> : vector<2x4096xf32>
    %3 = tpu.matmul %1, %2, %cst_4 {dimension_numbers = #tpu.dot_dimension_numbers<[1], [0], [0], [1], [0, 0, 1, 1], [], []>} : vector<2x16xf32>, vector<16x4096xf32>, vector<2x4096xf32> -> vector<2x4096xf32>
    %c0_5 = arith.constant 0 : index
    %c0_6 = arith.constant 0 : index
    %4 = vector.load %arg3[%c0_5, %c0_6] : memref<2x4096xf32, #tpu.memory_space<vmem>>, vector<2x4096xf32>
    tpu.vector_store %arg3[%c0_5, %c0_6], %3 {strides = array<i32>} : memref<2x4096xf32, #tpu.memory_space<vmem>>, vector<2x4096xf32>,
    return
  }
  func.func @transform_0(%arg0: i32) -> (i32, i32, i32) {
    %c0_i32 = arith.constant 0 : i32
    %c0_i32_0 = arith.constant 0 : i32
    %c0_i32_1 = arith.constant 0 : i32
    %c0_i32_2 = arith.constant 0 : i32
    return %c0_i32, %c0_i32_0, %c0_i32_1 : i32, i32, i32
  }
  func.func @transform_1(%arg0: i32) -> (i32, i32) {
    %c0_i32 = arith.constant 0 : i32
    %c0_i32_0 = arith.constant 0 : i32
    %c0_i32_1 = arith.constant 0 : i32
    return %c0_i32, %c0_i32_0 : i32, i32
  }
  func.func @transform_2(%arg0: i32) -> (i32, i32) {
    %c0_i32 = arith.constant 0 : i32
    %c0_i32_0 = arith.constant 0 : i32
    %c0_i32_1 = arith.constant 0 : i32
    return %c0_i32, %c0_i32_0 : i32, i32
  }
}

</mosaic_0001>

<bundles_post_ra>
// kernel: tpu_custom_call.1
= control target key start
LH: loop header
LB: loop body
LE: loop exit
PB: predicated region body
PF: predicated region fallthrough
CT: control target
= control target key end

     0   :  { %7 = vsyncpa [#allocation3], 0  ;;  %s1754_s0 = inlined_call_operand.hbm [shape: f32[2,8,16], index: 0, kind: input, shape index: {}]   ;;  %s1755_s1 = inlined_call_operand.hbm [shape: f32[16,4096], index: 1, kind: input, shape index: {}]   ;;  %s1756_s2 = inlined_call_operand.hbm [shape: f32[2,4096], index: 2, kind: output, shape index: {}]  }
   0x1   :  { %8 = vsyncpa [#allocation6], 0 }
   0x2   :  { %9 = vsyncpa [#allocation4], 0  ;;  %s1624_s9 = smov [#allocation2]   ;;  %s1552_s13 = scalar_lea.hbm %s1754_s0, 256 }
   0x3   :  { %s15_s10 = sshll.u32 %s1624_s9, 4  ;;  %p1553_p0 = scmp.ne.s32.totalorder %s1754_s0, %s1552_s13  ;;  %s16_s10 = int_to_ptr.vmem [resolvable:$true] %s15_s10 }
   0x4   :  { %p1556_p1 = scmp.lt.u32.totalorder %s1552_s13, %s1754_s0 }
   0x6   :  { %p1558_p2 = pnand %p1556_p1, %p1553_p0 }
   0x8   :  { %1561 = shalt.err (!%p1558_p2)
}
   0x9   :  { %s1562_s18 = scalar_lea.vmem %s16_s10, 256  ;;  %p1567_p4 = scmp.lt.s32.totalorder %s16_s10, %s16_s10 }
   0xa   :  { %p1563_p3 = scmp.ne.s32.totalorder %s16_s10, %s1562_s18  ;;  %p1568_p5 = scmp.lt.s32.totalorder %s1562_s18, %s1562_s18 }
   0xc   :  { %p1569_p6 = por %p1568_p5, %p1567_p4 }
   0xe   :  { %p1570_p7 = pnand %p1569_p6, %p1563_p3 }
  0x10   :  { %1573 = shalt.err (!%p1570_p7)
}
  0x11   :  { %s1625_s19 = smov 128   ;;  %s1626_s20 = smov 8  }
  0x12   :  { %21 = dma.hbm_to_vmem [thread:$0]  %s1754_s0, 256, %s16_s10, [#allocation3], %s1625_s19, %s1625_s19, %s1626_s20  }
  0x13   :  { %s1627_s23 = smov [#allocation5]   ;;  %s1574_s27 = scalar_lea.hbm %s1755_s1, 8192 }
  0x14   :  { %s27_s24 = sshll.u32 %s1627_s23, 4  ;;  %p1575_p8 = scmp.ne.s32.totalorder %s1755_s1, %s1574_s27  ;;  %s28_s24 = int_to_ptr.vmem [resolvable:$true] %s27_s24 }
  0x15   :  { %p1578_p9 = scmp.lt.u32.totalorder %s1574_s27, %s1755_s1 }
  0x17   :  { %p1580_p10 = pnand %p1578_p9, %p1575_p8 }
  0x19   :  { %1583 = shalt.err (!%p1580_p10)
}
  0x1a   :  { %s1584_s4 = scalar_lea.vmem %s28_s24, 8192  ;;  %p1589_p12 = scmp.lt.s32.totalorder %s28_s24, %s28_s24 }
  0x1b   :  { %p1585_p11 = scmp.ne.s32.totalorder %s28_s24, %s1584_s4  ;;  %p1590_p13 = scmp.lt.s32.totalorder %s1584_s4, %s1584_s4 }
  0x1d   :  { %p1591_p0 = por %p1590_p13, %p1589_p12 }
  0x1f   :  { %p1592_p1 = pnand %p1591_p0, %p1585_p11 }
  0x21   :  { %1595 = shalt.err (!%p1592_p1)
}
  0x22   :  { %s1628_s0 = smov 4096   ;;  %s1629_s5 = smov 256  }
  0x23   :  { %33 = dma.hbm_to_vmem [thread:$0]  %s1755_s1, 8192, %s28_s24, [#allocation6], %s1628_s0, %s1628_s0, %s1629_s5  }
  0x24   :  { %1618 = dma.done.wait [#allocation3], 256  }
  0x25   :  { %1619 = vsyncadd [#allocation3], 4294967040 }
  0x26   :  { %1620 = dma.done.wait [#allocation6], 8192  }
  0x27   :  { %1621 = vsyncadd [#allocation6], 4294959104  ;;  %v1630_v0 = vmov 0.0   ;;  %v58_v1 = vld [vmem:[#allocation5 + $0x8] sm:$0xff]  ;;  %v60_v3 = vld [vmem:[#allocation5 + $0x18] sm:$0xff]  ;;  %vm42_vm0 = vcmask 130048  }
  0x28   :  { %191 = vmatprep.mubr.f32.mxu0 %v1630_v0  ;;  %262 = vmatprep.mubr.f32.mxu1 %v1630_v0  ;;  %v90_v2 = vld [vmem:[#allocation5 + $0x108] sm:$0xff]  ;;  %v92_v5 = vld [vmem:[#allocation5 + $0x118] sm:$0xff]  ;;  %v57_v6 = vld [vmem:[#allocation5] sm:$0xff]  ;;  %vm123_vm1 = vcmask 1041409   ;;  %s1632_s1 = smov [#allocation7]  }
  0x29   :  { %v1479_v4 = vpack.c.bf16 %v90_v2, %v58_v1  ;;  %v89_v7 = vld [vmem:[#allocation5 + $0x100] sm:$0xff]  ;;  %v1483_v8 = vpack.c.bf16 %v92_v5, %v60_v3  ;;  %v59_v10 = vld [vmem:[#allocation5 + $0x10] sm:$0xff]  ;;  %v62_v12 = vld [vmem:[#allocation5 + $0x28] sm:$0xff]  ;;  %s1453_s8 = sshll.u32 %s1632_s1, 4  ;;  %s1454_s8 = int_to_ptr.vmem [resolvable:$true] %s1453_s8 }
  0x2a   :  { %v1481_v9 = vpack.c.bf16 %v89_v7, %v57_v6  ;;  %v91_v11 = vld [vmem:[#allocation5 + $0x110] sm:$0xff]  ;;  %v94_v14 = vld [vmem:[#allocation5 + $0x128] sm:$0xff]  ;;  %v64_v15 = vld [vmem:[#allocation5 + $0x38] sm:$0xff]  ;;  %s1596_s9 = scalar_lea.vmem %s1454_s8, 1024  ;;  %p1601_p3 = scmp.lt.s32.totalorder %s1454_s8, %s1454_s8 }
  0x2b   :  { %1480 = vmatprep.subr.bf16.mxu0 %v1479_v4  ;;  %v1485_v13 = vpack.c.bf16 %v91_v11, %v59_v10  ;;  %v96_v16 = vld [vmem:[#allocation5 + $0x138] sm:$0xff]  ;;  %1484 = vmatprep.subr.bf16.mxu1 %v1483_v8  ;;  %v1487_v17 = vpack.c.bf16 %v94_v14, %v62_v12  ;;  %v40_v19 = vld [vmem:[#allocation2] sm:$0xff]  ;;  %v61_v31 = vld [vmem:[#allocation5 + $0x20] sm:$0xff]  ;;  %p1597_p2 = scmp.ne.s32.totalorder %s1454_s8, %s1596_s9  ;;  %p1602_p4 = scmp.lt.s32.totalorder %s1596_s9, %s1596_s9 }
  0x2c   :  { %1482 = vmatpush1.bf16.msra.mxu0 %v1481_v9  ;;  %v1491_v18 = vpack.c.bf16 %v96_v16, %v64_v15  ;;  %v41_v20 = vld [vmem:[#allocation2 + $0x8] sm:$0xff]  ;;  %v43_v21 = vsel %vm42_vm0, %v40_v19, 0.0  ;;  %v93_v32 = vld [vmem:[#allocation5 + $0x120] sm:$0xff]  ;;  %v63_v33 = vld [vmem:[#allocation5 + $0x30] sm:$0xff] }
  0x2d   :  { %1486 = vmatpush1.bf16.msra.mxu1 %v1485_v13  ;;  %v50_v22 = vsel %vm42_vm0, %v41_v20, 0.0  ;;  %1488 = vmatprep.subr.bf16.mxu0 %v1487_v17  ;;  %v44_v23 = vrot.slane %v43_v21, 4  ;;  %v95_v34 = vld [vmem:[#allocation5 + $0x130] sm:$0xff]  ;;  %v66_v37 = vld [vmem:[#allocation5 + $0x48] sm:$0xff]  ;;  %v68_v39 = vld [vmem:[#allocation5 + $0x58] sm:$0xff]  ;;  %v1489_v43 = vpack.c.bf16 %v93_v32, %v61_v31  ;;  %p1603_p5 = por %p1602_p4, %p1601_p3 }
  0x2e   :  { %1492 = vmatprep.subr.bf16.mxu1 %v1491_v18  ;;  %v51_v24 = vrot.slane %v50_v22, 4  ;;  %v98_v38 = vld [vmem:[#allocation5 + $0x148] sm:$0xff]  ;;  %v100_v40 = vld [vmem:[#allocation5 + $0x158] sm:$0xff]  ;;  %v1493_v44 = vpack.c.bf16 %v95_v34, %v63_v33  ;;  %v65_v45 = vld [vmem:[#allocation5 + $0x40] sm:$0xff] }
  0x2f   :  { %v45_v25 = vadd.f32 %v44_v23, %v43_v21  ;;  %v97_v46 = vld [vmem:[#allocation5 + $0x140] sm:$0xff]  ;;  %v67_v47 = vld [vmem:[#allocation5 + $0x50] sm:$0xff]  ;;  %v1495_v50 = vpack.c.bf16 %v98_v38, %v66_v37  ;;  %v1499_v51 = vpack.c.bf16 %v100_v40, %v68_v39  ;;  %v70_v52 = vld [vmem:[#allocation5 + $0x68] sm:$0xff]  ;;  %p1604_p6 = pnand %p1603_p5, %p1597_p2 }
  0x30   :  { %v52_v26 = vadd.f32 %v51_v24, %v50_v22  ;;  %v99_v48 = vld [vmem:[#allocation5 + $0x150] sm:$0xff]  ;;  %v102_v53 = vld [vmem:[#allocation5 + $0x168] sm:$0xff]  ;;  %v72_v54 = vld [vmem:[#allocation5 + $0x78] sm:$0xff]  ;;  %v1497_v56 = vpack.c.bf16 %v97_v46, %v65_v45 }
  0x31   :  { %v46_v27 = vrot.slane %v45_v25, 2  ;;  %v104_v55 = vld [vmem:[#allocation5 + $0x178] sm:$0xff]  ;;  %v1501_v57 = vpack.c.bf16 %v99_v48, %v67_v47  ;;  %v69_v58 = vld [vmem:[#allocation5 + $0x60] sm:$0xff]  ;;  %v71_v60 = vld [vmem:[#allocation5 + $0x70] sm:$0xff]  ;;  %v1503_v62 = vpack.c.bf16 %v102_v53, %v70_v52  ;;  %v1631_v52 = vmov 1983009808  }
  0x32   :  { %v53_v28 = vrot.slane %v52_v26, 2  ;;  %v101_v59 = vld [vmem:[#allocation5 + $0x160] sm:$0xff]  ;;  %v103_v61 = vld [vmem:[#allocation5 + $0x170] sm:$0xff]  ;;  %v1507_v63 = vpack.c.bf16 %v104_v55, %v72_v54  ;;  %v74_v1 = vld [vmem:[#allocation5 + $0x88] sm:$0xff]  ;;  %v1298_v53 = vunpack.c.l.s4 %v1631_v52  ;;  %v1300_v54 = vlaneseq }
  0x33   :  { %v47_v29 = vadd.f32 %v46_v27, %v45_v25  ;;  %v106_v2 = vld [vmem:[#allocation5 + $0x188] sm:$0xff]  ;;  %v76_v3 = vld [vmem:[#allocation5 + $0x98] sm:$0xff]  ;;  %v1505_v5 = vpack.c.bf16 %v101_v59, %v69_v58  ;;  %v1509_v6 = vpack.c.bf16 %v103_v61, %v71_v60  ;;  %v73_v7 = vld [vmem:[#allocation5 + $0x80] sm:$0xff] }
  0x34   :  { %v54_v30 = vadd.f32 %v53_v28, %v52_v26  ;;  %v108_v4 = vld [vmem:[#allocation5 + $0x198] sm:$0xff]  ;;  %v105_v8 = vld [vmem:[#allocation5 + $0x180] sm:$0xff]  ;;  %v75_v9 = vld [vmem:[#allocation5 + $0x90] sm:$0xff]  ;;  %v1511_v11 = vpack.c.bf16 %v106_v2, %v74_v1  ;;  %v1299_v55 = vunpack.c.0.s8 %v1298_v53 }
  0x35   :  { %v48_v35 = vrot.slane %v47_v29, 1  ;;  %v107_v10 = vld [vmem:[#allocation5 + $0x190] sm:$0xff]  ;;  %v1515_v12 = vpack.c.bf16 %v108_v4, %v76_v3  ;;  %v78_v13 = vld [vmem:[#allocation5 + $0xa8] sm:$0xff]  ;;  %v80_v15 = vld [vmem:[#allocation5 + $0xb8] sm:$0xff]  ;;  %v1513_v17 = vpack.c.bf16 %v105_v8, %v73_v7 }
  0x36   :  { %v55_v36 = vrot.slane %v54_v30, 1  ;;  %v110_v14 = vld [vmem:[#allocation5 + $0x1a8] sm:$0xff]  ;;  %v112_v16 = vld [vmem:[#allocation5 + $0x1b8] sm:$0xff]  ;;  %v1517_v18 = vpack.c.bf16 %v107_v10, %v75_v9  ;;  %v77_v19 = vld [vmem:[#allocation5 + $0xa0] sm:$0xff] }
  0x37   :  { %v49_v41 = vadd.f32 %v48_v35, %v47_v29  ;;  %v109_v20 = vld [vmem:[#allocation5 + $0x1a0] sm:$0xff]  ;;  %v79_v21 = vld [vmem:[#allocation5 + $0xb0] sm:$0xff]  ;;  %v1519_v23 = vpack.c.bf16 %v110_v14, %v78_v13  ;;  %v1523_v24 = vpack.c.bf16 %v112_v16, %v80_v15  ;;  %v82_v25 = vld [vmem:[#allocation5 + $0xc8] sm:$0xff] }
  0x38   :  { %v56_v42 = vadd.f32 %v55_v36, %v54_v30  ;;  %v111_v22 = vld [vmem:[#allocation5 + $0x1b0] sm:$0xff]  ;;  %v114_v26 = vld [vmem:[#allocation5 + $0x1c8] sm:$0xff]  ;;  %v84_v27 = vld [vmem:[#allocation5 + $0xd8] sm:$0xff]  ;;  %v1521_v29 = vpack.c.bf16 %v109_v20, %v77_v19 }
  0x39   :  { %v116_v28 = vld [vmem:[#allocation5 + $0x1d8] sm:$0xff]  ;;  %v1525_v30 = vpack.c.bf16 %v111_v22, %v79_v21  ;;  %v81_v31 = vld [vmem:[#allocation5 + $0xc0] sm:$0xff]  ;;  %v83_v33 = vld [vmem:[#allocation5 + $0xd0] sm:$0xff]  ;;  %v1527_v35 = vpack.c.bf16 %v114_v26, %v82_v25 }
  0x3a   :  { %v1676_v49 = vsel %vm123_vm1, %v56_v42, %v49_v41  ;;  %v113_v32 = vld [vmem:[#allocation5 + $0x1c0] sm:$0xff]  ;;  %v115_v34 = vld [vmem:[#allocation5 + $0x1d0] sm:$0xff]  ;;  %v1531_v36 = vpack.c.bf16 %v116_v28, %v84_v27  ;;  %v86_v37 = vld [vmem:[#allocation5 + $0xe8] sm:$0xff] }
  0x3b   :  { %1463 = vmatmul.mubr.msk.f32.vlgmr.msra.gmra.mrb[0].mxu0 %vm42_vm0, %v1676_v49  ;;  %1464 = vmatmul.mubr.msk.f32.vlgmr.msra.gmra.mrb[0].mxu1 %vm42_vm0, %v1676_v49  ;;  %v118_v38 = vld [vmem:[#allocation5 + $0x1e8] sm:$0xff]  ;;  %v88_v39 = vld [vmem:[#allocation5 + $0xf8] sm:$0xff]  ;;  %v1529_v41 = vpack.c.bf16 %v113_v32, %v81_v31  ;;  %v1533_v42 = vpack.c.bf16 %v115_v34, %v83_v33  ;;  %v87_v45 = vld [vmem:[#allocation5 + $0xf0] sm:$0xff] }
  0x3c   :  { %1490 = vmatpush1.bf16.msra.mxu0 %v1489_v43  ;;  %1494 = vmatpush1.bf16.msra.mxu1 %v1493_v44  ;;  %v120_v40 = vld [vmem:[#allocation5 + $0x1f8] sm:$0xff]  ;;  %v85_v43 = vld [vmem:[#allocation5 + $0xe0] sm:$0xff]  ;;  %v119_v46 = vld [vmem:[#allocation5 + $0x1f0] sm:$0xff]  ;;  %v1535_v47 = vpack.c.bf16 %v118_v38, %v86_v37 }
  0x3d   :  { %333 = vmatprep.mubr.f32.mxu0 %v1630_v0  ;;  %404 = vmatprep.mubr.f32.mxu1 %v1630_v0  ;;  %v117_v44 = vld [vmem:[#allocation5 + $0x1e0] sm:$0xff]  ;;  %v1539_v48 = vpack.c.bf16 %v120_v40, %v88_v39 }
  0x3e   :  { %1496 = vmatprep.subr.bf16.mxu0 %v1495_v50  ;;  %1500 = vmatprep.subr.bf16.mxu1 %v1499_v51  ;;  %v1537_v50 = vpack.c.bf16 %v117_v44, %v85_v43  ;;  %v1541_v51 = vpack.c.bf16 %v119_v46, %v87_v45 }
  0x3f   :  { %1465 = vmatmul.mubr.msk.f32.vlgmr.msra.gmra.mrb[2].mxu0 %vm42_vm0, %v1676_v49  ;;  %1466 = vmatmul.mubr.msk.f32.vlgmr.msra.gmra.mrb[2].mxu1 %vm42_vm0, %v1676_v49 }
  0x40   :  { %1498 = vmatpush1.bf16.msra.mxu0 %v1497_v56  ;;  %1502 = vmatpush1.bf16.msra.mxu1 %v1501_v57  ;;  %v1301_v56 = vshrl.u32 %v1300_v54, 7 }
  0x41   :  { %475 = vmatprep.mubr.f32.mxu0 %v1630_v0  ;;  %546 = vmatprep.mubr.f32.mxu1 %v1630_v0 }
  0x42   :  { %1504 = vmatprep.subr.bf16.mxu0 %v1503_v62  ;;  %1508 = vmatprep.subr.bf16.mxu1 %v1507_v63  ;;  %v1724_v59 = vsub.s32 %v1299_v55, %v1301_v56 }
  0x43   :  { %1467 = vmatmul.mubr.msk.f32.vlgmr.msra.gmra.mrb[4].mxu0 %vm42_vm0, %v1676_v49  ;;  %1468 = vmatmul.mubr.msk.f32.vlgmr.msra.gmra.mrb[4].mxu1 %vm42_vm0, %v1676_v49 }
  0x44   :  { %1506 = vmatpush1.bf16.msra.mxu0 %v1505_v5  ;;  %1510 = vmatpush1.bf16.msra.mxu1 %v1509_v6 }
  0x45   :  { %617 = vmatprep.mubr.f32.mxu0 %v1630_v0  ;;  %688 = vmatprep.mubr.f32.mxu1 %v1630_v0 }
  0x46   :  { %1512 = vmatprep.subr.bf16.mxu0 %v1511_v11  ;;  %1516 = vmatprep.subr.bf16.mxu1 %v1515_v12 }
  0x47   :  { %1469 = vmatmul.mubr.msk.f32.vlgmr.msra.gmra.mrb[6].mxu0 %vm42_vm0, %v1676_v49  ;;  %1470 = vmatmul.mubr.msk.f32.vlgmr.msra.gmra.mrb[6].mxu1 %vm42_vm0, %v1676_v49 }
  0x48   :  { %1514 = vmatpush1.bf16.msra.mxu0 %v1513_v17  ;;  %1518 = vmatpush1.bf16.msra.mxu1 %v1517_v18 }
  0x49   :  { %759 = vmatprep.mubr.f32.mxu0 %v1630_v0  ;;  %830 = vmatprep.mubr.f32.mxu1 %v1630_v0 }
  0x4a   :  { %1520 = vmatprep.subr.bf16.mxu0 %v1519_v23  ;;  %1524 = vmatprep.subr.bf16.mxu1 %v1523_v24 }
  0x4b   :  { %1471 = vmatmul.mubr.msk.f32.vlgmr.msra.gmra.mrb[8].mxu0 %vm42_vm0, %v1676_v49  ;;  %1472 = vmatmul.mubr.msk.f32.vlgmr.msra.gmra.mrb[8].mxu1 %vm42_vm0, %v1676_v49 }
  0x4c   :  { %1522 = vmatpush1.bf16.msra.mxu0 %v1521_v29  ;;  %1526 = vmatpush1.bf16.msra.mxu1 %v1525_v30 }
  0x4d   :  { %901 = vmatprep.mubr.f32.mxu0 %v1630_v0  ;;  %972 = vmatprep.mubr.f32.mxu1 %v1630_v0 }
  0x4e   :  { %1528 = vmatprep.subr.bf16.mxu0 %v1527_v35  ;;  %1532 = vmatprep.subr.bf16.mxu1 %v1531_v36 }
  0x4f   :  { %1473 = vmatmul.mubr.msk.f32.vlgmr.msra.gmra.mrb[10].mxu0 %vm42_vm0, %v1676_v49  ;;  %1474 = vmatmul.mubr.msk.f32.vlgmr.msra.gmra.mrb[10].mxu1 %vm42_vm0, %v1676_v49 }
  0x50   :  { %1530 = vmatpush1.bf16.msra.mxu0 %v1529_v41  ;;  %1534 = vmatpush1.bf16.msra.mxu1 %v1533_v42 }
  0x51   :  { %1043 = vmatprep.mubr.f32.mxu0 %v1630_v0  ;;  %1114 = vmatprep.mubr.f32.mxu1 %v1630_v0 }
  0x52   :  { %1536 = vmatprep.subr.bf16.mxu0 %v1535_v47  ;;  %1540 = vmatprep.subr.bf16.mxu1 %v1539_v48 }
  0x53   :  { %1475 = vmatmul.mubr.msk.f32.vlgmr.msra.gmra.mrb[12].mxu0 %vm42_vm0, %v1676_v49  ;;  %1476 = vmatmul.mubr.msk.f32.vlgmr.msra.gmra.mrb[12].mxu1 %vm42_vm0, %v1676_v49 }
  0x54   :  { %1538 = vmatpush1.bf16.msra.mxu0 %v1537_v50  ;;  %1542 = vmatpush1.bf16.msra.mxu1 %v1541_v51 }
  0x55   :  { %1185 = vmatprep.mubr.f32.mxu0 %v1630_v0  ;;  %1256 = vmatprep.mubr.f32.mxu1 %v1630_v0 }
  0x57   :  { %1477 = vmatmul.mubr.msk.f32.vlgmr.msra.gmra.mrb[14].mxu0 %vm42_vm0, %v1676_v49  ;;  %1478 = vmatmul.mubr.msk.f32.vlgmr.msra.gmra.mrb[14].mxu1 %vm42_vm0, %v1676_v49 }
 0x10e   :  { %v193_v57 = vpop.f32.mrb[0].mxu0  ;;  %v264_v58 = vpop.f32.mrb[0].mxu1 }
 0x10f   :  { %v195_v60 = vpop.f32.mrb[1].mxu0  ;;  %v266_v61 = vpop.f32.mrb[1].mxu1 }
 0x110   :  { %v1295_v62 = vcombine.low %v193_v57, %v195_v60  ;;  %v1296_v63 = vcombine.low %v264_v58, %v266_v61 }
 0x112   :  { %v1303_v0 = vrot.slane %v1295_v62, %v1724_v59  ;;  %v1310_v1 = vrot.slane %v1296_v63, %v1724_v59  ;;  %v335_v2 = vpop.f32.mrb[2].mxu0  ;;  %v406_v3 = vpop.f32.mrb[2].mxu1 }
 0x113   :  { %v337_v49 = vpop.f32.mrb[3].mxu0  ;;  %v408_v4 = vpop.f32.mrb[3].mxu1 }
 0x114   :  { %v1311_v5 = vcombine.low %v1303_v0, %v1310_v1  ;;  %v1312_v6 = vcombine.low %v335_v2, %v337_v49  ;;  %v1313_v7 = vcombine.low %v406_v3, %v408_v4 }
 0x116   :  { %1439 = vst [vmem:[#allocation7] sm:$0xff] %v1311_v5  ;;  %v1320_v8 = vrot.slane %v1312_v6, %v1724_v59  ;;  %v1327_v9 = vrot.slane %v1313_v7, %v1724_v59  ;;  %v477_v10 = vpop.f32.mrb[4].mxu0  ;;  %v548_v11 = vpop.f32.mrb[4].mxu1 }
 0x117   :  { %v479_v12 = vpop.f32.mrb[5].mxu0  ;;  %v550_v13 = vpop.f32.mrb[5].mxu1 }
 0x118   :  { %v1328_v14 = vcombine.low %v1320_v8, %v1327_v9  ;;  %v1329_v15 = vcombine.low %v477_v10, %v479_v12  ;;  %v1330_v16 = vcombine.low %v548_v11, %v550_v13 }
 0x11a   :  { %1440 = vst [vmem:[#allocation7 + $0x8] sm:$0xff] %v1328_v14  ;;  %v1337_v17 = vrot.slane %v1329_v15, %v1724_v59  ;;  %v1344_v18 = vrot.slane %v1330_v16, %v1724_v59  ;;  %v619_v19 = vpop.f32.mrb[6].mxu0  ;;  %v690_v20 = vpop.f32.mrb[6].mxu1 }
 0x11b   :  { %v621_v21 = vpop.f32.mrb[7].mxu0  ;;  %v692_v22 = vpop.f32.mrb[7].mxu1 }
 0x11c   :  { %v1345_v23 = vcombine.low %v1337_v17, %v1344_v18  ;;  %v1346_v24 = vcombine.low %v619_v19, %v621_v21  ;;  %v1347_v25 = vcombine.low %v690_v20, %v692_v22 }
 0x11e   :  { %1441 = vst [vmem:[#allocation7 + $0x10] sm:$0xff] %v1345_v23  ;;  %v1354_v26 = vrot.slane %v1346_v24, %v1724_v59  ;;  %v1361_v27 = vrot.slane %v1347_v25, %v1724_v59  ;;  %v761_v28 = vpop.f32.mrb[8].mxu0  ;;  %v832_v29 = vpop.f32.mrb[8].mxu1 }
 0x11f   :  { %v763_v30 = vpop.f32.mrb[9].mxu0  ;;  %v834_v31 = vpop.f32.mrb[9].mxu1 }
 0x120   :  { %v1362_v32 = vcombine.low %v1354_v26, %v1361_v27  ;;  %v1363_v33 = vcombine.low %v761_v28, %v763_v30  ;;  %v1364_v34 = vcombine.low %v832_v29, %v834_v31 }
 0x122   :  { %1442 = vst [vmem:[#allocation7 + $0x18] sm:$0xff] %v1362_v32  ;;  %v1371_v35 = vrot.slane %v1363_v33, %v1724_v59  ;;  %v1378_v36 = vrot.slane %v1364_v34, %v1724_v59  ;;  %v903_v37 = vpop.f32.mrb[10].mxu0  ;;  %v974_v38 = vpop.f32.mrb[10].mxu1 }
 0x123   :  { %v905_v39 = vpop.f32.mrb[11].mxu0  ;;  %v976_v40 = vpop.f32.mrb[11].mxu1 }
 0x124   :  { %v1379_v41 = vcombine.low %v1371_v35, %v1378_v36  ;;  %v1380_v42 = vcombine.low %v903_v37, %v905_v39  ;;  %v1381_v43 = vcombine.low %v974_v38, %v976_v40 }
 0x126   :  { %1443 = vst [vmem:[#allocation7 + $0x20] sm:$0xff] %v1379_v41  ;;  %v1388_v44 = vrot.slane %v1380_v42, %v1724_v59  ;;  %v1395_v45 = vrot.slane %v1381_v43, %v1724_v59  ;;  %v1045_v46 = vpop.f32.mrb[12].mxu0  ;;  %v1116_v47 = vpop.f32.mrb[12].mxu1 }
 0x127   :  { %v1047_v48 = vpop.f32.mrb[13].mxu0  ;;  %v1118_v50 = vpop.f32.mrb[13].mxu1 }
 0x128   :  { %v1396_v51 = vcombine.low %v1388_v44, %v1395_v45  ;;  %v1397_v52 = vcombine.low %v1045_v46, %v1047_v48  ;;  %v1398_v53 = vcombine.low %v1116_v47, %v1118_v50 }
 0x12a   :  { %1444 = vst [vmem:[#allocation7 + $0x28] sm:$0xff] %v1396_v51  ;;  %v1405_v54 = vrot.slane %v1397_v52, %v1724_v59  ;;  %v1412_v55 = vrot.slane %v1398_v53, %v1724_v59  ;;  %v1187_v56 = vpop.f32.mrb[14].mxu0  ;;  %v1258_v57 = vpop.f32.mrb[14].mxu1 }
 0x12b   :  { %v1189_v58 = vpop.f32.mrb[15].mxu0  ;;  %v1260_v60 = vpop.f32.mrb[15].mxu1 }
 0x12c   :  { %v1413_v61 = vcombine.low %v1405_v54, %v1412_v55  ;;  %v1414_v62 = vcombine.low %v1187_v56, %v1189_v58  ;;  %v1415_v63 = vcombine.low %v1258_v57, %v1260_v60 }
 0x12e   :  { %1445 = vst [vmem:[#allocation7 + $0x30] sm:$0xff] %v1413_v61  ;;  %v1422_v0 = vrot.slane %v1414_v62, %v1724_v59  ;;  %v1429_v1 = vrot.slane %v1415_v63, %v1724_v59 }
 0x130   :  { %v1430_v2 = vcombine.low %v1422_v0, %v1429_v1 }
 0x132   :  { %1446 = vst [vmem:[#allocation7 + $0x38] sm:$0xff] %v1430_v2 }
 0x133   :  { %1607 = shalt.err (!%p1604_p6)
}
 0x134   :  { %s1608_s12 = scalar_lea.hbm %s1756_s2, 1024 }
 0x135   :  { %p1609_p7 = scmp.ne.s32.totalorder %s1756_s2, %s1608_s12  ;;  %p1612_p8 = scmp.lt.u32.totalorder %s1608_s12, %s1756_s2 }
 0x137   :  { %p1614_p9 = pnand %p1612_p8, %p1609_p7 }
 0x139   :  { %1617 = shalt.err (!%p1614_p9)
}
 0x13a   :  { %1456 = dma.vmem_to_hbm [thread:$0]  %s1454_s8, 1024, %s1756_s2, [#allocation4]  }
 0x13b   :  { %1622 = dma.done.wait [#allocation4], 1024  }
 0x13c   :  { %1623 = vsyncadd [#allocation4], 4294966272 }
 0x13d   :  { %1460 = vsyncpa [#allocation3], 1 }
 0x13e   :  { %1461 = vsyncpa [#allocation6], 1 }
 0x13f   :  { %1462 = vsyncpa [#allocation4], 1 }

</bundles_post_ra>
